<compile_context>
chip_gen: v5e
topology: v5e:2x2
jax: 0.10.0
libtpu: 0.0.40
codegen_flags: <defaults>
</compile_context>

<pallas_src>
import functools

import jax
import jax.numpy as jnp
from jax.experimental import pallas as pl
from jax.experimental.pallas import tpu as pltpu


# Safe scoped-VMEM budget across generations (v7x has only 64 MiB physical).
_VMEM_BUDGET_BYTES = 48 << 20
# Target size for one streamed x block (1-8 MiB range per measured roofline).
_TARGET_BLOCK_BYTES = 4 << 20
# Prefer at least this many grid steps so double-buffering amortizes the
# ~0.35 us per-step overhead and both v7x TensorCores get work.
_MIN_GRID_STEPS = 8


def _pick_batch_block(B, C, L, itemsize):
    """Largest divisor of B whose block stays within the byte cap while
    keeping (when the batch allows it) at least _MIN_GRID_STEPS grid steps."""
    per_sample_bytes = C * L * itemsize
    cap_bytes = max(1, _TARGET_BLOCK_BYTES // per_sample_bytes)
    if B >= _MIN_GRID_STEPS:
        cap = max(1, min(cap_bytes, B // _MIN_GRID_STEPS))
    else:
        cap = max(1, min(cap_bytes, B))
    bb = 1
    for d in range(1, min(cap, B) + 1):
        if B % d == 0:
            bb = d
    return bb


def _att_layer_kernel(x_ref, w1_ref, w2_ref, o_ref):
    # x_ref : (BB, C, L)   block of the input
    # w1_ref: (C, R)       first Linear weight (transposed vs. torch layout)
    # w2_ref: (1, R)       second Linear weight (torch layout, row vector)
    # o_ref : (BB, C, L)

    # Squeeze: AdaptiveAvgPool1d(1) == mean over length.  Accumulate in f32
    # even for bf16 inputs.  This read's live range ends right here.
    y = jnp.mean(x_ref[...].astype(jnp.float32), axis=-1)               # (BB, C)

    # Excitation MLP, batched over the whole batch block (M = BB).
    h = jnp.maximum(
        jnp.dot(y, w1_ref[...].astype(jnp.float32),
                preferred_element_type=jnp.float32), 0.0)               # (BB, R)
    # R -> 1 projection as VPU multiply + lane reduction (avoids N=1 matmul).
    s = jax.nn.sigmoid(
        jnp.sum(h * w2_ref[...].astype(jnp.float32),
                axis=-1, keepdims=True))                                # (BB, 1)

    # Re-read x_ref (short live range) and do a single lane-dense store.
    # bf16 inputs promote to f32 for the multiply, then cast back on store.
    o_ref[...] = (x_ref[...] * s[:, :, None]).astype(o_ref.dtype)


def att_layer(x, w1, w2, *, batch_block=None):
    """x: (B, C, L); w1: (C, R); w2: (1, R). Returns x * gate(x) of shape (B, C, L)."""
    B, C, L = x.shape
    R = w1.shape[1]
    assert w1.shape == (C, R) and w2.shape == (1, R)

    itemsize = jnp.dtype(x.dtype).itemsize
    per_sample_bytes = C * L * itemsize
    # Guard the single-pass design: one sample (x in + out, double buffered)
    # must fit the per-generation VMEM budget.
    assert 4 * per_sample_bytes <= _VMEM_BUDGET_BYTES, (
        "C*L too large for the single-pass gate kernel; needs the two-phase "
        "fallback (see TODO at top of file).")

    if batch_block is None:
        batch_block = _pick_batch_block(B, C, L, itemsize)
    assert B % batch_block == 0, "batch_block must divide the batch size"
    grid = (B // batch_block,)

    # VMEM budget: 2 pipeline buffers x (x block + out block) + weights + headroom.
    block_bytes = batch_block * per_sample_bytes
    weight_bytes = (C * R + R) * 4
    vmem_needed = 4 * block_bytes + 2 * weight_bytes
    vmem_limit_bytes = int(min(_VMEM_BUDGET_BYTES,
                               max(vmem_needed + (4 << 20), 16 << 20)))

    cost = pl.CostEstimate(
        flops=2 * B * C * R + 2 * B * R + 2 * B * C * L,   # MLP + mean + scale
        transcendentals=B,                                  # one sigmoid/sample
        bytes_accessed=2 * B * C * L * itemsize + 2 * weight_bytes,
    )

    return pl.pallas_call(
        _att_layer_kernel,
        out_shape=jax.ShapeDtypeStruct((B, C, L), x.dtype),
        grid_spec=pltpu.PrefetchScalarGridSpec(
            num_scalar_prefetch=0,
            grid=grid,
            in_specs=[
                pl.BlockSpec((batch_block, C, L), lambda i: (i, 0, 0)),
                pl.BlockSpec((C, R), lambda i: (0, 0)),
                pl.BlockSpec((1, R), lambda i: (0, 0)),
            ],
            out_specs=pl.BlockSpec((batch_block, C, L), lambda i: (i, 0, 0)),
        ),
        compiler_params=pltpu.CompilerParams(
            dimension_semantics=("parallel",),
            vmem_limit_bytes=vmem_limit_bytes,
        ),
        cost_estimate=cost,
    )(x, w1, w2)


if __name__ == "__main__":
    key = jax.random.PRNGKey(0)
    k_x, k_w1, k_w2 = jax.random.split(key, 3)

    # Small shapes consistent with AttLayer: x is (batch, out_channels, length).
    B, C, L = 8, 64, 128
    reduction = 16
    R = max(C // reduction, 1)

    x = jax.random.normal(k_x, (B, C, L), jnp.float32)
    # nn.Linear(C, R, bias=False).weight is (R, C); we store its transpose (C, R).
    w1 = jax.random.normal(k_w1, (C, R), jnp.float32) / jnp.sqrt(float(C))
    # nn.Linear(R, 1, bias=False).weight is (1, R); stored as-is.
    w2 = jax.random.normal(k_w2, (1, R), jnp.float32) / jnp.sqrt(float(R))

    fwd = jax.jit(functools.partial(att_layer))
    out = jax.block_until_ready(fwd(x, w1, w2))

    # Pure-JAX reference (same math as the PyTorch module).
    y_ref = jnp.mean(x, axis=-1)
    h_ref = jnp.maximum(y_ref @ w1, 0.0)
    s_ref = jax.nn.sigmoid(jnp.sum(h_ref * w2, axis=-1, keepdims=True))
    ref = x * s_ref[:, :, None]

    assert out.shape == (B, C, L)
    assert bool(jnp.all(jnp.isfinite(out)))
    assert bool(jnp.allclose(out, ref, atol=1e-5, rtol=1e-5))
    print("KERNEL_OK")
</pallas_src>

<mosaic_0001>
module attributes {stable_mosaic.version = 11 : i64} {
  func.func @_att_layer_kernel(%arg0: i32, %arg1: memref<1x64x128xf32, #tpu.memory_space<vmem>>, %arg2: memref<64x4xf32, #tpu.memory_space<vmem>>, %arg3: memref<1x4xf32, #tpu.memory_space<vmem>>, %arg4: memref<1x64x128xf32, #tpu.memory_space<vmem>>) attributes {dimension_semantics = [#tpu.dimension_semantics<parallel>], iteration_bounds = array<i64: 8>, scalar_prefetch = 0 : i64, scratch_operands = 0 : i64, tpu.core_type = #tpu.core_type<tc>, window_params = [{transform_indices = @transform_0, window_bounds = array<i64: 1, 64, 128>}, {pipeline_mode = #tpu.pipeline_mode<synchronous>, transform_indices = @transform_1, window_bounds = array<i64: 64, 4>}, {pipeline_mode = #tpu.pipeline_mode<synchronous>, transform_indices = @transform_2, window_bounds = array<i64: 1, 4>}, {transform_indices = @transform_3, window_bounds = array<i64: 1, 64, 128>}]} {
    %c0 = arith.constant 0 : index
    %c0_0 = arith.constant 0 : index
    %c0_1 = arith.constant 0 : index
    %0 = vector.load %arg1[%c0, %c0_0, %c0_1] : memref<1x64x128xf32, #tpu.memory_space<vmem>>, vector<1x64x128xf32>
    %cst = arith.constant dense<0.000000e+00> : vector<1x64xf32>
    %1 = vector.multi_reduction <add>, %0, %cst [2] : vector<1x64x128xf32> to vector<1x64xf32>
    %cst_2 = arith.constant 1.280000e+02 : f32
    %2 = vector.broadcast %cst_2 : f32 to vector<1x64xf32>
    %3 = arith.divf %1, %2 : vector<1x64xf32>
    %c0_3 = arith.constant 0 : index
    %c0_4 = arith.constant 0 : index
    %4 = vector.load %arg2[%c0_3, %c0_4] : memref<64x4xf32, #tpu.memory_space<vmem>>, vector<64x4xf32>
    %cst_5 = arith.constant dense<0.000000e+00> : vector<1x4xf32>
    %5 = tpu.matmul %3, %4, %cst_5 {dimension_numbers = #tpu.dot_dimension_numbers<[1], [0], [0], [1], [0, 0, 1, 1], [], []>} : vector<1x64xf32>, vector<64x4xf32>, vector<1x4xf32> -> vector<1x4xf32>
    %cst_6 = arith.constant 0.000000e+00 : f32
    %6 = vector.broadcast %cst_6 : f32 to vector<1x4xf32>
    %7 = arith.maximumf %5, %6 : vector<1x4xf32>
    %c0_7 = arith.constant 0 : index
    %c0_8 = arith.constant 0 : index
    %8 = vector.load %arg3[%c0_7, %c0_8] : memref<1x4xf32, #tpu.memory_space<vmem>>, vector<1x4xf32>
    %9 = arith.mulf %7, %8 : vector<1x4xf32>
    %cst_9 = arith.constant dense<0.000000e+00> : vector<1xf32>
    %10 = vector.multi_reduction <add>, %9, %cst_9 [1] : vector<1x4xf32> to vector<1xf32>
    %11 = vector.shape_cast %10 : vector<1xf32> to vector<1x1xf32>
    %12 = arith.negf %11 : vector<1x1xf32>
    %13 = math.exp %12 : vector<1x1xf32>
    %cst_10 = arith.constant 1.000000e+00 : f32
    %14 = vector.broadcast %cst_10 : f32 to vector<1x1xf32>
    %15 = arith.addf %14, %13 : vector<1x1xf32>
    %16 = arith.divf %14, %15 : vector<1x1xf32>
    %c0_11 = arith.constant 0 : index
    %c0_12 = arith.constant 0 : index
    %c0_13 = arith.constant 0 : index
    %17 = vector.load %arg1[%c0_11, %c0_12, %c0_13] : memref<1x64x128xf32, #tpu.memory_space<vmem>>, vector<1x64x128xf32>
    %18 = vector.shape_cast %16 : vector<1x1xf32> to vector<1x1x1xf32>
    %19 = vector.broadcast %18 : vector<1x1x1xf32> to vector<1x64x128xf32>
    %20 = arith.mulf %17, %19 : vector<1x64x128xf32>
    %c0_14 = arith.constant 0 : index
    %c0_15 = arith.constant 0 : index
    %c0_16 = arith.constant 0 : index
    %21 = vector.load %arg4[%c0_14, %c0_15, %c0_16] : memref<1x64x128xf32, #tpu.memory_space<vmem>>, vector<1x64x128xf32>
    tpu.vector_store %arg4[%c0_14, %c0_15, %c0_16], %20 {strides = array<i32>} : memref<1x64x128xf32, #tpu.memory_space<vmem>>, vector<1x64x128xf32>,
    return
  }
  func.func @transform_0(%arg0: i32) -> (i32, i32, i32) {
    %c0_i32 = arith.constant 0 : i32
    %c0_i32_0 = arith.constant 0 : i32
    %c0_i32_1 = arith.constant 0 : i32
    return %arg0, %c0_i32, %c0_i32_0 : i32, i32, i32
  }
  func.func @transform_1(%arg0: i32) -> (i32, i32) {
    %c0_i32 = arith.constant 0 : i32
    %c0_i32_0 = arith.constant 0 : i32
    %c0_i32_1 = arith.constant 0 : i32
    return %c0_i32, %c0_i32_0 : i32, i32
  }
  func.func @transform_2(%arg0: i32) -> (i32, i32) {
    %c0_i32 = arith.constant 0 : i32
    %c0_i32_0 = arith.constant 0 : i32
    %c0_i32_1 = arith.constant 0 : i32
    return %c0_i32, %c0_i32_0 : i32, i32
  }
  func.func @transform_3(%arg0: i32) -> (i32, i32, i32) {
    %c0_i32 = arith.constant 0 : i32
    %c0_i32_0 = arith.constant 0 : i32
    %c0_i32_1 = arith.constant 0 : i32
    return %arg0, %c0_i32, %c0_i32_0 : i32, i32, i32
  }
}

</mosaic_0001>

<bundles_post_ra>
// kernel: att_layer.1
= control target key start
LH: loop header
LB: loop body
LE: loop exit
PB: predicated region body
PF: predicated region fallthrough
CT: control target
= control target key end

     0   :  { %8 = vsyncpa [#allocation3], 0  ;;  %s818_s0 = inlined_call_operand.hbm [shape: f32[8,64,128], index: 0, kind: input, shape index: {}]   ;;  %s819_s1 = inlined_call_operand.vmem [shape: f32[64,4], index: 1, kind: input, shape index: {}]   ;;  %s820_s2 = inlined_call_operand.vmem [shape: f32[1,4], index: 2, kind: input, shape index: {}]   ;;  %s821_s3 = inlined_call_operand.hbm [shape: f32[8,64,128], index: 3, kind: output, shape index: {}]  }
   0x1   :  { %10 = vsyncpa [#allocation3 + $0x1], 0 }
   0x2   :  { %11 = vsyncpa [#allocation4], 0 }
   0x3   :  { %13 = vsyncpa [#allocation4 + $0x1], 0  ;;  %s630_s12 = smov 0   ;;  %s632_s13 = smov 0  }
   0x4   :  { %s634_s14 = smov 0   ;;  %s636_s15 = smov 0  }
   0x5 LB: > { %s651_s16 = sadd.s32 4294967295, %s603_s15   ;;  %s432_s17 = sadd.s32 4294967294, %s603_s15   ;;  %s603_s15 = sphi %s636_s15, %s830_s15   ;;  %s599_s14 = sphi %s634_s14, %s829_s14   ;;  %s595_s13 = sphi %s632_s13, %s828_s13   ;;  %s591_s12 = sphi %s630_s12, %s827_s12  }
   0x6   : > { %s655_s18 = sadd.s32 1, %s603_s15   ;;  %s26_s19 = sadd.s32 1, %s599_s14 }
   0x7   : > { %s23_s20 = ssub.s32 %s603_s15, %s655_s18  ;;  %p33_p0 = scmp.ne.s32.totalorder %s599_s14, %s595_s13 }
   0x8   : > { %p24_p1 = scmp.eq.s32.totalorder %s23_s20, 0  ;;  %p34_p2 = scmp.eq.s32.totalorder %s603_s15, 0 }
   0x9   : > { %p39_p3 = scmp.ne.s32.totalorder %s595_s13, %s591_s12  ;;  %p40_p4 = scmp.eq.s32.totalorder %s651_s16, 0 }
   0xa   : > { %s667_s21 = scalar_select %p24_p1, %s599_s14, %s26_s19  }
   0xb   : > { %p669_p5 = por %p34_p2, %p33_p0  ;;  %p673_p6 = por %p40_p4, %p39_p3 }
   0xc   : > { %p105_p7 = scmp.eq.s32.totalorder %s651_s16, 7  ;;  %p111_p8 = scmp.eq.s32.totalorder %s432_s17, 7 }
   0xd   : > { %p462_p9 = scmp.lt.s32.totalorder %s603_s15, 8  ;;  %s137_s26 = sand.u32 1, %s599_s14  }
   0xe   : > { %p679_p10 = por %p105_p7, %p33_p0  ;;  %p683_p11 = por %p111_p8, %p39_p3 }
   0xf   : > { %s448_s27 = sshll.u32 %s603_s15, 6  ;;  %s435_s28 = sshll.u32 %s137_s26, 6 }
  0x10   : > { %s146_s4 = scalar_lea.hbm %s818_s0, %s448_s27  ;;  %s141_s6 = scalar_lea.vmem [#allocation2], %s435_s28 }
  0x11   : > { %s147_s5 = sshll.u32 %s146_s4, 4  ;;  %s149_s7 = sshll.u32 %s141_s6, 4  ;;  %s148_s5 = int_to_ptr.hbm [resolvable:$true] %s147_s5  ;;  %s150_s7 = int_to_ptr.vmem [resolvable:$true] %s149_s7 }
  0x12   : > { %p694_p12 = pnand %p462_p9, %p669_p5  ;;  %p438_p13 = scmp.ge.s32.totalorder %s603_s15, 1 }
  0x13   : > { %p157_p0 = scmp.lt.s32.totalorder %s603_s15, 9  ;;  %s138_s9 = scalar_lea.sflag [#allocation3], %s137_s26 }
  0x14   : > { %s507_s10 = sshra.s32 %s148_s5, 4  ;;  %p511_p2 = pneg %p694_p12  ;;  %s508_s10 = int_to_ptr.hbm [resolvable:$true] %s507_s10 }
  0x15   : > { %s509_s11 = scalar_lea.hbm %s508_s10, 64  ;;  %s514_s20 = scalar_lea.hbm %s818_s0, 512 }
  0x16   : > { %p510_p1 = scmp.ne.s32.totalorder %s508_s10, %s509_s11  ;;  %p515_p5 = scmp.lt.s32.totalorder %s508_s10, %s818_s0 }
  0x17   : > { %p516_p7 = scmp.lt.s32.totalorder %s514_s20, %s509_s11 }
  0x18   : > { %p512_p3 = pnand %p511_p2, %p510_p1 }
  0x19   : > { %p517_p8 = por %p516_p7, %p515_p5 }
  0x1a   : > { %p513_p4 = pneg %p512_p3 }
  0x1c   : > { %p518_p9 = pnand %p517_p8, %p513_p4 }
  0x1e   : > { %521 = shalt.err (!%p518_p9)
}
  0x1f   : > { %s605_s26 = smov 128   ;;  %s606_s28 = smov 8  }
  0x20   : > { %457 = dma.hbm_to_vmem [thread:$0]  (!%p694_p12), %s148_s5, 1024, %s150_s7, %s138_s9, %s605_s26, %s605_s26, %s606_s28  }
  0x21   : > { %p158_p1 = pnand %p438_p13, %p157_p0 }
  0x22   : > { %s715_s29 = sand.u32 (!%p158_p1), 1, %s595_s13  }
  0x23   : > { %161 = sbr.rel (%p158_p1) target bundleno = 470 (0x1d6), region = 32  ;;  %s439_s30 = sshll.u32 (!%p158_p1), %s715_s29, 6 }
  0x24   : > { %s164_s4 = scalar_lea.sflag (!%p158_p1), [#allocation3], %s715_s29  ;;  %s167_s6 = scalar_lea.vmem (!%p158_p1), [#allocation2], %s439_s30 }
  0x28   : > { %582 = dma.done.wait (%p673_p6), %s164_s4, 1024  }
  0x29   : > { %584 = vsyncadd (%p673_p6), %s164_s4, 4294966272  ;;  %v725_v0 = vld [vmem:[%s167_s6] sm:$0xff]  ;;  %v727_v1 = vld [vmem:[%s167_s6 + $0x10] sm:$0xff]  ;;  %v607_v10 = vmov 128.0   ;;  %v246_v22 = vlaneseq  ;;  %vm251_vm1 = vcmask 130112   ;;  %vm255_vm2 = vcmask 195712  }
  0x2a   : > { %v729_v2 = vld [vmem:[%s167_s6 + $0x20] sm:$0xff]  ;;  %199 = vadd.xlane.f32.xlu0 %v725_v0  ;;  %203 = vadd.xlane.f32.xlu1 %v727_v1  ;;  %v734_v3 = vld [vmem:[%s167_s6 + $0x8] sm:$0xff]  ;;  %v736_v4 = vld [vmem:[%s167_s6 + $0x18] sm:$0xff]  ;;  %501 = vrcp.f32 %v607_v10  ;;  %vm259_vm3 = vcmask 261312   ;;  %vm263_vm4 = vcmask 326912   ;;  %vm267_vm5 = vcmask 392512  }
  0x2b   : > { %207 = vadd.xlane.f32.xlu2 %v729_v2  ;;  %v738_v5 = vld [vmem:[%s167_s6 + $0x28] sm:$0xff]  ;;  %v743_v6 = vld [vmem:[%s167_s6 + $0x30] sm:$0xff]  ;;  %v745_v7 = vld [vmem:[%s167_s6 + $0x38] sm:$0xff]  ;;  %v247_v27 = vand.u32 127, %v246_v22  ;;  %vm271_vm6 = vcmask 458112   ;;  %vm275_vm7 = vcmask 523712  }
  0x2c   : > { %v237_v8 = vld [vmem:[%s819_s1 + $0x38] sm:$0xff]  ;;  %v236_v9 = vld [vmem:[%s819_s1 + $0x30] sm:$0xff]  ;;  %v235_v11 = vld [vmem:[%s819_s1 + $0x28] sm:$0xff]  ;;  %vm277_vm8 = vcmask 523264   ;;  %vm303_vm9 = vcmask 24576   ;;  %s449_s7 = sshll.u32 %s651_s16, 6 }
  0x2d   : > { %288 = vmatpush.msra.mxu0 %v237_v8  ;;  %v234_v12 = vld [vmem:[%s819_s1 + $0x20] sm:$0xff]  ;;  %v233_v13 = vld [vmem:[%s819_s1 + $0x18] sm:$0xff]  ;;  %v232_v15 = vld [vmem:[%s819_s1 + $0x10] sm:$0xff]  ;;  %v249_v29 = vadd.s32 4294967288, %v247_v27  ;;  %v257_v30 = vadd.s32 4294967272, %v247_v27  ;;  %v253_v31 = vadd.s32 4294967280, %v247_v27  ;;  %s355_s10 = scalar_lea.hbm %s821_s3, %s449_s7 }
  0x2e   : > { %v231_v16 = vld [vmem:[%s819_s1 + $0x8] sm:$0xff]  ;;  %v230_v17 = vld [vmem:[%s819_s1] sm:$0xff]  ;;  %v261_v38 = vadd.s32 4294967264, %v247_v27  ;;  %v265_v44 = vadd.s32 4294967256, %v247_v27  ;;  %v269_v50 = vadd.s32 4294967248, %v247_v27  ;;  %v273_v51 = vadd.s32 4294967240, %v247_v27 }
  0x2f   : > { %289 = vmatpush.msra.mxu0 %v236_v9  ;;  %v301_v8 = vld [vmem:[%s820_s2] sm:$0x1]  ;;  %s190_s11 = scalar_lea.vmem [#allocation5], %s439_s30  ;;  %s358_s17 = sshll.u32 %s355_s10, 4  ;;  %s359_s17 = int_to_ptr.hbm [resolvable:$true] %s358_s17 }
  0x30   : > { %v502_v14 = vpop.eup %501  ;;  %s356_s16 = sshll.u32 %s190_s11, 4  ;;  %s344_s30 = scalar_lea.sflag [#allocation4], %s715_s29  ;;  %s357_s16 = int_to_ptr.vmem [resolvable:$true] %s356_s16 }
  0x31   : > { %290 = vmatpush.msra.mxu0 %v235_v11  ;;  %v216_v18 = vmul.f32 128.0, %v502_v14  ;;  %vm220_vm0 = vweird.f32 %v502_v14  ;;  %s551_s19 = sshra.s32 %s359_s17, 4  ;;  %s557_s26 = scalar_lea.hbm %s821_s3, 512  ;;  %s552_s19 = int_to_ptr.hbm [resolvable:$true] %s551_s19 }
  0x32   : > { %201 = vadd.xlane.f32.xlu0 %v734_v3  ;;  %205 = vadd.xlane.f32.xlu1 %v736_v4  ;;  %s553_s20 = scalar_lea.hbm %s552_s19, 64  ;;  %p558_p0 = scmp.lt.s32.totalorder %s552_s19, %s821_s3 }
  0x33   : > { %209 = vadd.xlane.f32.xlu2 %v738_v5  ;;  %291 = vmatpush.msra.mxu0 %v234_v12  ;;  %v217_v19 = vsub.f32 1.0, %v216_v18  ;;  %p554_p6 = scmp.ne.s32.totalorder %s552_s19, %s553_s20  ;;  %p559_p2 = scmp.lt.s32.totalorder %s557_s26, %s553_s20 }
  0x35   : > { %292 = vmatpush.msra.mxu0 %v233_v13  ;;  %v218_v20 = vmul.f32 %v502_v14, %v217_v19  ;;  %p555_p12 = pnand %p554_p6, %p679_p10  ;;  %p560_p3 = por %p559_p2, %p558_p0 }
  0x37   : > { %293 = vmatpush.msra.mxu0 %v232_v15  ;;  %v219_v21 = vadd.f32 %v502_v14, %v218_v20  ;;  %p556_p13 = pneg %p555_p12 }
  0x39   : > { %294 = vmatpush.msra.mxu0 %v231_v16  ;;  %v221_v26 = vsel %vm220_vm0, %v502_v14, %v219_v21  ;;  %p561_p4 = pnand %p560_p3, %p556_p13 }
  0x3a   : > { %211 = vadd.xlane.f32.xlu0 %v743_v6  ;;  %213 = vadd.xlane.f32.xlu1 %v745_v7 }
  0x3b   : > { %295 = vmatpush.msra.mxu0 %v230_v17 }
  0x9d   : > { %v200_v23 = vpop.xlane.xlu0 %199  ;;  %v204_v24 = vpop.xlane.xlu1 %203 }
  0x9e   : > { %v208_v25 = vpop.xlane.xlu2 %207  ;;  %v222_v28 = vmul.f32 %v221_v26, %v200_v23  ;;  %v224_v32 = vmul.f32 %v221_v26, %v204_v24 }
  0x9f   : > { %v226_v40 = vmul.f32 %v221_v26, %v208_v25 }
  0xa0   : > { %v248_v39 = vperm.slane %v222_v28, %v247_v27  ;;  %v254_v43 = vperm.slane %v224_v32, %v253_v31 }
  0xa1   : > { %v262_v48 = vperm.slane %v226_v40, %v261_v38 }
  0xa5   : > { %v202_v33 = vpop.xlane.xlu0 %201  ;;  %v206_v34 = vpop.xlane.xlu1 %205 }
  0xa6   : > { %v223_v35 = vmul.f32 %v221_v26, %v202_v33  ;;  %v225_v36 = vmul.f32 %v221_v26, %v206_v34  ;;  %v210_v37 = vpop.xlane.xlu2 %209 }
  0xa7   : > { %v227_v45 = vmul.f32 %v221_v26, %v210_v37 }
  0xa8   : > { %v250_v41 = vperm.slane %v223_v35, %v249_v29  ;;  %v258_v42 = vperm.slane %v225_v36, %v257_v30 }
  0xa9   : > { %v266_v52 = vperm.slane %v227_v45, %v265_v44 }
  0xaa   : > { %v252_v46 = vsel %vm251_vm1, %v250_v41, %v248_v39 }
  0xab   : > { %v256_v47 = vsel %vm255_vm2, %v254_v43, %v252_v46 }
  0xac   : > { %v260_v49 = vsel %vm259_vm3, %v258_v42, %v256_v47 }
  0xad   : > { %v212_v53 = vpop.xlane.xlu0 %211  ;;  %v214_v54 = vpop.xlane.xlu1 %213  ;;  %v264_v57 = vsel %vm263_vm4, %v262_v48, %v260_v49 }
  0xae   : > { %v228_v55 = vmul.f32 %v221_v26, %v212_v53  ;;  %v229_v56 = vmul.f32 %v221_v26, %v214_v54  ;;  %v268_v60 = vsel %vm267_vm5, %v266_v52, %v264_v57 }
  0xb0   : > { %v270_v58 = vperm.slane %v228_v55, %v269_v50  ;;  %v274_v59 = vperm.slane %v229_v56, %v273_v51 }
  0xb2   : > { %v272_v61 = vsel %vm271_vm6, %v270_v58, %v268_v60 }
  0xb3   : > { %v276_v62 = vsel %vm275_vm7, %v274_v59, %v272_v61 }
  0xb4   : > { %441 = vmatmul.msk.f32.vlgmr.msra.gmra.mxu0 %vm277_vm8, %v276_v62 }
 0x131   : > { %v297_v63 = vpop.f32.mrf.mxu0 }
 0x132   : > { %v300_v9 = vmax.f32 %v297_v63, 0.0 }
 0x134   : > { %v302_v10 = vmul.f32 %v301_v8, %v300_v9 }
 0x136   : > { %v304_v11 = vsel %vm303_vm9, %v302_v10, 0.0 }
 0x137   : > { %305 = vadd.xlane.f32.xlu2 %v304_v11 }
 0x1aa   : > { %v306_v12 = vpop.xlane.xlu2 %305 }
 0x1ab   : > { %v442_v13 = vmul.f32 -1.442695, %v306_v12 }
 0x1ad   : > { %503 = vpow2.f32 %v442_v13 }
 0x1b3   : > { %v504_v14 = vpop.eup %503 }
 0x1b4   : > { %v310_v15 = vadd.f32 1.0, %v504_v14 }
 0x1b6   : > { %505 = vrcp.f32 %v310_v15  ;;  %v322_v19 = vand.u32 2147483648, %v310_v15  ;;  %v320_v21 = vand.u32 2147483647, %v310_v15  ;;  %vm316_vm11 = vweird.f32 %v310_v15 }
 0x1b8   : > { %v323_v23 = vor.u32 1.1754944e-38, %v322_v19  ;;  %vm321_vm13 = vcmp.eq.f32.partialorder %v320_v21, 8.507059e+37 }
 0x1bc   : > { %v506_v16 = vpop.eup %505 }
 0x1bd   : > { %v312_v17 = vmul.f32 %v506_v16, %v310_v15  ;;  %vm317_vm10 = vweird.f32 %v506_v16 }
 0x1be   : > { %vm318_vm12 = vmor %vm316_vm11, %vm317_vm10 }
 0x1bf   : > { %v313_v18 = vsub.f32 1.0, %v312_v17 }
 0x1c1   : > { %v314_v20 = vmul.f32 %v506_v16, %v313_v18 }
 0x1c3   : > { %v315_v22 = vadd.f32 %v506_v16, %v314_v20 }
 0x1c5   : > { %v319_v24 = vsel %vm318_vm12, %v506_v16, %v315_v22 }
 0x1c6   : > { %v324_v25 = vsel %vm321_vm13, %v323_v23, %v319_v24 }
 0x1c7   : > { %v326_v26 = vperm.slane %v324_v25, 0 }
 0x1c9   : > { %v327_v27 = vmul.f32 %v326_v26, %v725_v0  ;;  %v328_v28 = vmul.f32 %v326_v26, %v734_v3  ;;  %v329_v29 = vmul.f32 %v326_v26, %v727_v1  ;;  %v330_v30 = vmul.f32 %v326_v26, %v736_v4 }
 0x1ca   : > { %v331_v31 = vmul.f32 %v326_v26, %v729_v2  ;;  %v332_v32 = vmul.f32 %v326_v26, %v738_v5  ;;  %v333_v0 = vmul.f32 %v326_v26, %v743_v6  ;;  %v334_v1 = vmul.f32 %v326_v26, %v745_v7 }
 0x1cb   : > { %335 = vst [vmem:[%s190_s11] sm:$0xff] %v327_v27 }
 0x1cc   : > { %336 = vst [vmem:[%s190_s11 + $0x8] sm:$0xff] %v328_v28 }
 0x1cd   : > { %337 = vst [vmem:[%s190_s11 + $0x10] sm:$0xff] %v329_v29 }
 0x1ce   : > { %338 = vst [vmem:[%s190_s11 + $0x18] sm:$0xff] %v330_v30 }
 0x1cf   : > { %339 = vst [vmem:[%s190_s11 + $0x20] sm:$0xff] %v331_v31 }
 0x1d0   : > { %340 = vst [vmem:[%s190_s11 + $0x28] sm:$0xff] %v332_v32 }
 0x1d1   : > { %341 = vst [vmem:[%s190_s11 + $0x30] sm:$0xff] %v333_v0 }
 0x1d2   : > { %342 = vst [vmem:[%s190_s11 + $0x38] sm:$0xff] %v334_v1 }
 0x1d3   : > { %564 = shalt.err (!%p561_p4)
}
 0x1d4   : > { %s608_s29 = smov 128   ;;  %s609_s6 = smov 8  }
 0x1d5   : > { %452 = dma.vmem_to_hbm [thread:$0]  (%p679_p10), %s357_s16, 1024, %s359_s17, %s344_s30, %s608_s29, %s608_s29, %s609_s6  }
 0x1d6 PF: > { %p463_p5 = scmp.ge.s32.totalorder %s603_s15, 2  ;;  %s373_s23 = sand.u32 1, %s591_s12  }
 0x1d7   : > { %s374_s5 = scalar_lea.sflag [#allocation4], %s373_s23 }
 0x1d8   : > { %p459_p7 = pnand %p463_p5, %p683_p11 }
 0x1da   : > { %p460_p8 = pneg %p459_p7 }
 0x1dc   : > { %586 = dma.done.wait (%p460_p8), %s374_s5, 1024  }
 0x1dd   : > { %588 = vsyncadd (%p460_p8), %s374_s5, 4294966272  ;;  %p16_p9 = scmp.ge.s32.totalorder %s655_s18, 10   ;;  %s827_s12 = smov %s595_s13 }
 0x1de   : > { %s828_s13 = smov %s599_s14  ;;  %s829_s14 = smov %s667_s21 }
 0x1df   : > { %s830_s15 = smov %s655_s18  ;;  %18 = sbr.rel (!%p16_p9) target bundleno = 5 (0x5), region = 77 }
 0x1e4   :  { %380 = vsyncpa [#allocation3], 1 }
 0x1e5   :  { %382 = vsyncpa [#allocation3 + $0x1], 1 }
 0x1e6   :  { %383 = vsyncpa [#allocation4], 1 }
 0x1e7   :  { %385 = vsyncpa [#allocation4 + $0x1], 1 }

</bundles_post_ra>
